<compile_context>
chip_gen: v5e
topology: v5e:2x2
jax: 0.10.0
libtpu: 0.0.40
codegen_flags: <defaults>
</compile_context>

<pallas_src>
import functools

import numpy as np
import jax
import jax.numpy as jnp
from jax.experimental import pallas as pl
from jax.experimental.pallas import tpu as pltpu


def _ls_ce_kernel(x_ref, tgt_ref, psum_ref, *,
                  confidence, smoothing, n_rows, block_rows):
    i = pl.program_id(0)

    x = x_ref[...].astype(jnp.float32)        # (TM, C) logits (bf16 inputs upcast here)
    tgt = tgt_ref[...]                        # (TM, 1) int32 class index per row
    c = x.shape[-1]

    # Numerically stable logsumexp along the class (lane) axis.
    m = jnp.max(x, axis=-1, keepdims=True)
    lse = jnp.log(jnp.sum(jnp.exp(x - m), axis=-1, keepdims=True)) + m     # (TM, 1)

    # Fused one-hot gather + uniform term (single weighted lane reduction):
    #   loss_row = lse - confidence*x[t] - (smoothing/C)*sum(x) = lse - sum(w*x)
    uni = smoothing / c
    lane = jax.lax.broadcasted_iota(jnp.int32, x.shape, 1)
    w = jnp.where(lane == tgt, confidence + uni, uni)
    loss = lse - jnp.sum(w * x, axis=-1, keepdims=True)                    # (TM, 1)

    # Mask rows beyond N (partial last block); select discards garbage (even NaN/Inf).
    row = jax.lax.broadcasted_iota(jnp.int32, loss.shape, 0) + i * block_rows
    loss = jnp.where(row < n_rows, loss, 0.0)

    # Per-block partial, broadcast into the full (1, 8, 128) tile so the writeback is an
    # unmasked lane-dense store; the host reads element [:, 0, 0] of each block.
    block_sum = jnp.sum(loss, axis=(0, 1), keepdims=True)                  # (1, 1)
    psum_ref[...] = jnp.broadcast_to(block_sum[None], psum_ref.shape)


def _vmem_capacity_bytes():
    """Physical VMEM per TensorCore; conservative fallback if the query is unavailable."""
    try:
        return int(getattr(pltpu.get_tpu_info(), "vmem_capacity_bytes"))
    except Exception:
        return 64 << 20      # v7x per-TC size; safe (just smaller tiles) elsewhere


def _pick_block_rows(n, c, x_dtype, vmem_budget_bytes):
    """Row-tile size from a VMEM byte budget (no artificial row cap)."""
    itemsize = jnp.dtype(x_dtype).itemsize
    # dtype-aware sublane packing: f32 -> 8 rows/vreg, bf16 -> 16, int8/fp8 -> 32.
    row_mult = {4: 8, 2: 16, 1: 32}.get(itemsize, 8)
    # Per-row VMEM footprint:
    #   2x-buffered (TM, C) x tile:                               2 * C * itemsize
    #   2x-buffered (TM, 1) int32 target tile (pads to 128 lanes): 2 * 512
    #   live f32 (TM, C) intermediates (upcast, exp, weights, iota): ~4 * C * 4
    bytes_per_row = 2 * c * itemsize + 2 * 512 + 4 * c * 4
    tm = vmem_budget_bytes // bytes_per_row
    # Keep a single x tile <= ~8 MiB so the pipeline still has >1 step to overlap.
    tm = min(tm, (8 << 20) // max(1, c * itemsize))
    tm = max(row_mult, (tm // row_mult) * row_mult)
    if n <= tm:
        return n             # single full-extent block (block dims == array dims is allowed)
    return tm                # multiple of row_mult; remainder rows masked in-kernel


def label_smoothing_cross_entropy(x, target, smoothing=0.1, block_rows=None):
    """JAX/Pallas equivalent of timm LabelSmoothingCrossEntropy.forward(x, target)."""
    assert smoothing < 1.0
    confidence = 1.0 - smoothing
    n, c = x.shape

    vmem_cap = _vmem_capacity_bytes()
    if block_rows is None:
        tm = _pick_block_rows(n, c, x.dtype, vmem_cap // 2)
    else:
        tm = min(int(block_rows), n)
    grid = pl.cdiv(n, tm)

    kernel = functools.partial(
        _ls_ce_kernel,
        confidence=float(confidence),
        smoothing=float(smoothing),
        n_rows=int(n),
        block_rows=int(tm),
    )

    partials = pl.pallas_call(
        kernel,
        out_shape=jax.ShapeDtypeStruct((grid, 8, 128), jnp.float32),
        grid=(grid,),
        in_specs=[
            pl.BlockSpec((tm, c), lambda i: (i, 0)),       # (TM, C) logits tile
            pl.BlockSpec((tm, 1), lambda i: (i, 0)),       # (TM, 1) targets tile
        ],
        out_specs=pl.BlockSpec((1, 8, 128), lambda i: (i, 0, 0)),   # per-block partial tile
        compiler_params=pltpu.CompilerParams(
            dimension_semantics=("parallel",),             # independent blocks -> both TCs on v7x
            vmem_limit_bytes=int(vmem_cap * 3 // 4),
        ),
    )(x, target.astype(jnp.int32).reshape(n, 1))

    # Finish the mean outside the kernel (also better numerics than a serial scalar carry).
    return jnp.sum(partials[:, 0, 0]) / n


def _reference(x, target, smoothing=0.1):
    """Pure-JAX reference mirroring the PyTorch forward exactly."""
    confidence = 1.0 - smoothing
    logprobs = jax.nn.log_softmax(x.astype(jnp.float32), axis=-1)
    nll = -jnp.take_along_axis(logprobs, target[:, None].astype(jnp.int32), axis=-1)[:, 0]
    smooth = -jnp.mean(logprobs, axis=-1)
    loss = confidence * nll + smoothing * smooth
    return jnp.mean(loss)


if __name__ == "__main__":
    key = jax.random.PRNGKey(0)
    kx, kt = jax.random.split(key)

    # Small shapes consistent with the module: batch=8, num_classes=32.
    N, C = 8, 32
    x = jax.random.normal(kx, (N, C), dtype=jnp.float32)
    target = jax.random.randint(kt, (N,), 0, C, dtype=jnp.int32)

    out = label_smoothing_cross_entropy(x, target, smoothing=0.1)
    out = jax.block_until_ready(out)
    ref = _reference(x, target, smoothing=0.1)
    np.testing.assert_allclose(np.asarray(out), np.asarray(ref), rtol=1e-5, atol=1e-5)

    # Exercise the multi-block "parallel" partials path + partial-last-tile masking.
    N2, C2 = 20, 32
    x2 = jax.random.normal(kx, (N2, C2), dtype=jnp.float32)
    target2 = jax.random.randint(kt, (N2,), 0, C2, dtype=jnp.int32)
    out2 = jax.block_until_ready(
        label_smoothing_cross_entropy(x2, target2, smoothing=0.1, block_rows=8))
    ref2 = _reference(x2, target2, smoothing=0.1)
    np.testing.assert_allclose(np.asarray(out2), np.asarray(ref2), rtol=1e-5, atol=1e-5)

    print("KERNEL_OK")
</pallas_src>

<mosaic_0001>
module attributes {stable_mosaic.version = 11 : i64} {
  func.func @_ls_ce_kernel(%arg0: i32, %arg1: memref<8x32xf32, #tpu.memory_space<vmem>>, %arg2: memref<8x1xi32, #tpu.memory_space<vmem>>, %arg3: memref<1x8x128xf32, #tpu.memory_space<vmem>>) attributes {dimension_semantics = [#tpu.dimension_semantics<parallel>], iteration_bounds = array<i64: 1>, scalar_prefetch = 0 : i64, scratch_operands = 0 : i64, tpu.core_type = #tpu.core_type<tc>, window_params = [{transform_indices = @transform_0, window_bounds = array<i64: 8, 32>}, {transform_indices = @transform_1, window_bounds = array<i64: 8, 1>}, {transform_indices = @transform_2, window_bounds = array<i64: 1, 8, 128>}]} {
    %c0 = arith.constant 0 : index
    %c0_0 = arith.constant 0 : index
    %0 = vector.load %arg1[%c0, %c0_0] : memref<8x32xf32, #tpu.memory_space<vmem>>, vector<8x32xf32>
    %c0_1 = arith.constant 0 : index
    %c0_2 = arith.constant 0 : index
    %1 = vector.load %arg2[%c0_1, %c0_2] : memref<8x1xi32, #tpu.memory_space<vmem>>, vector<8x1xi32>
    %cst = arith.constant dense<0xFF800000> : vector<8xf32>
    %2 = vector.multi_reduction <maximumf>, %0, %cst [1] : vector<8x32xf32> to vector<8xf32>
    %3 = vector.shape_cast %2 : vector<8xf32> to vector<8x1xf32>
    %4 = vector.broadcast %3 : vector<8x1xf32> to vector<8x32xf32>
    %5 = arith.subf %0, %4 : vector<8x32xf32>
    %6 = math.exp %5 : vector<8x32xf32>
    %cst_3 = arith.constant dense<0.000000e+00> : vector<8xf32>
    %7 = vector.multi_reduction <add>, %6, %cst_3 [1] : vector<8x32xf32> to vector<8xf32>
    %8 = vector.shape_cast %7 : vector<8xf32> to vector<8x1xf32>
    %9 = math.log %8 : vector<8x1xf32>
    %10 = arith.addf %9, %3 : vector<8x1xf32>
    %11 = tpu.iota {dimensions = array<i32: 1>} : vector<8x32xi32>
    %12 = vector.broadcast %1 : vector<8x1xi32> to vector<8x32xi32>
    %13 = arith.cmpi eq, %11, %12 : vector<8x32xi32>
    %cst_4 = arith.constant 0.903124988 : f32
    %cst_5 = arith.constant 3.125000e-03 : f32
    %14 = vector.broadcast %cst_4 : f32 to vector<8x32xf32>
    %15 = vector.broadcast %cst_5 : f32 to vector<8x32xf32>
    %16 = arith.select %13, %14, %15 : vector<8x32xi1>, vector<8x32xf32>
    %17 = arith.mulf %16, %0 : vector<8x32xf32>
    %cst_6 = arith.constant dense<0.000000e+00> : vector<8xf32>
    %18 = vector.multi_reduction <add>, %17, %cst_6 [1] : vector<8x32xf32> to vector<8xf32>
    %19 = vector.shape_cast %18 : vector<8xf32> to vector<8x1xf32>
    %20 = arith.subf %10, %19 : vector<8x1xf32>
    %21 = tpu.iota {dimensions = array<i32: 0>} : vector<8x1xi32>
    %c8_i32 = arith.constant 8 : i32
    %22 = arith.muli %arg0, %c8_i32 : i32
    %23 = vector.broadcast %22 : i32 to vector<8x1xi32>
    %24 = arith.addi %21, %23 : vector<8x1xi32>
    %c8_i32_7 = arith.constant 8 : i32
    %25 = vector.broadcast %c8_i32_7 : i32 to vector<8x1xi32>
    %26 = arith.cmpi slt, %24, %25 : vector<8x1xi32>
    %cst_8 = arith.constant 0.000000e+00 : f32
    %27 = vector.broadcast %cst_8 : f32 to vector<8x1xf32>
    %28 = arith.select %26, %20, %27 : vector<8x1xi1>, vector<8x1xf32>
    %29 = vector.shape_cast %28 : vector<8x1xf32> to vector<1x8x1xf32>
    %cst_9 = arith.constant dense<0.000000e+00> : vector<1xf32>
    %30 = vector.multi_reduction <add>, %29, %cst_9 [1, 2] : vector<1x8x1xf32> to vector<1xf32>
    %31 = vector.shape_cast %30 : vector<1xf32> to vector<1x1x1xf32>
    %32 = vector.extract %31[0, 0, 0] : f32 from vector<1x1x1xf32>
    %33 = vector.broadcast %32 : f32 to vector<1x1xf32>
    %34 = vector.shape_cast %33 : vector<1x1xf32> to vector<1x1x1xf32>
    %35 = vector.shape_cast %34 : vector<1x1x1xf32> to vector<1x1x1xf32>
    %36 = vector.broadcast %35 : vector<1x1x1xf32> to vector<1x8x128xf32>
    %c0_10 = arith.constant 0 : index
    %c0_11 = arith.constant 0 : index
    %c0_12 = arith.constant 0 : index
    %37 = vector.load %arg3[%c0_10, %c0_11, %c0_12] : memref<1x8x128xf32, #tpu.memory_space<vmem>>, vector<1x8x128xf32>
    tpu.vector_store %arg3[%c0_10, %c0_11, %c0_12], %36 {strides = array<i32>} : memref<1x8x128xf32, #tpu.memory_space<vmem>>, vector<1x8x128xf32>,
    return
  }
  func.func @transform_0(%arg0: i32) -> (i32, i32) {
    %c0_i32 = arith.constant 0 : i32
    %c0_i32_0 = arith.constant 0 : i32
    return %arg0, %c0_i32 : i32, i32
  }
  func.func @transform_1(%arg0: i32) -> (i32, i32) {
    %c0_i32 = arith.constant 0 : i32
    %c0_i32_0 = arith.constant 0 : i32
    return %arg0, %c0_i32 : i32, i32
  }
  func.func @transform_2(%arg0: i32) -> (i32, i32, i32) {
    %c0_i32 = arith.constant 0 : i32
    %c0_i32_0 = arith.constant 0 : i32
    %c0_i32_1 = arith.constant 0 : i32
    return %arg0, %c0_i32, %c0_i32_0 : i32, i32, i32
  }
}

</mosaic_0001>

<bundles_post_ra>
// kernel: tpu_custom_call.1
= control target key start
LH: loop header
LB: loop body
LE: loop exit
PB: predicated region body
PF: predicated region fallthrough
CT: control target
= control target key end

     0   :  { %vm14_vm0 = vcmask 261120   ;;  %s141_s0 = inlined_call_operand.vmem [shape: f32[8,32], index: 0, kind: input, shape index: {}]   ;;  %s142_s1 = inlined_call_operand.vmem [shape: s32[8,1], index: 1, kind: input, shape index: {}]   ;;  %s143_s2 = inlined_call_operand.hbm [shape: f32[1,8,128], index: 2, kind: output, shape index: {}]  }
   0x1   :  { %v12_v0 = vld [vmem:[%s141_s0] sm:$0xff] }
   0x2   :  { %7 = vsyncpa [#allocation3], 0  ;;  %v15_v1 = vsel %vm14_vm0, %v12_v0, -inf  ;;  %v111_v2 = vmov 0   ;;  %v13_v3 = vld [vmem:[%s142_s1] sm:$0xff]  ;;  %v27_v9 = vlaneseq  ;;  %vm46_vm2 = vcmask 7168  }
   0x3   :  { %80 = vset.pattern.permute.xlu0 %v111_v2  ;;  %v112_v12 = vmov 0.003125   ;;  %s113_s0 = smov [#allocation2]   ;;  %s66_s15 = sshll.u32 %s143_s2, 4  ;;  %s67_s15 = int_to_ptr.hbm [resolvable:$true] %s66_s15 }
   0x4   :  { %16 = vmax.xlane.f32.xlu0 %v15_v1  ;;  %v28_v10 = vand.u32 127, %v27_v9  ;;  %s64_s1 = sshll.u32 %s113_s0, 4  ;;  %s65_s1 = int_to_ptr.vmem [resolvable:$true] %s64_s1 }
  0x18   :  { %30 = vperm.xlu0 %80, %v13_v3  }
  0x77   :  { %v17_v4 = vpop.xlane.xlu0 %16 }
  0x78   :  { %v18_v5 = vsub.f32 %v12_v0, %v17_v4 }
  0x7a   :  { %v19_v6 = vmul.f32 1.442695, %v18_v5 }
  0x7c   :  { %81 = vpow2.f32 %v19_v6 }
  0x82   :  { %v82_v7 = vpop.eup %81 }
  0x83   :  { %v21_v8 = vsel %vm14_vm0, %v82_v7, 0.0 }
  0x84   :  { %22 = vadd.xlane.f32.xlu1 %v21_v8 }
  0x8a   :  { %v31_v11 = vpop.permute.xlu0 %30 }
  0x8b   :  { %vm32_vm1 = vcmp.eq.s32.totalorder %v28_v10, %v31_v11 }
  0x8c   :  { %v33_v13 = vsel %vm32_vm1, 0.903125, %v112_v12 }
  0x8d   :  { %v34_v14 = vmul.f32 %v33_v13, %v12_v0 }
  0x8f   :  { %v35_v15 = vsel %vm14_vm0, %v34_v14, 0.0 }
  0x90   :  { %36 = vadd.xlane.f32.xlu1 %v35_v15 }
  0xf7   :  { %v23_v16 = vpop.xlane.xlu1 %22 }
  0xf8   :  { %83 = vlog2.f32 %v23_v16 }
  0xfe   :  { %v84_v17 = vpop.eup %83 }
  0xff   :  { %v25_v18 = vmul.f32 0.6931472, %v84_v17 }
 0x101   :  { %v26_v19 = vadd.f32 %v25_v18, %v17_v4 }
 0x103   :  { %v37_v20 = vpop.xlane.xlu1 %36 }
 0x104   :  { %v38_v21 = vsub.f32 %v26_v19, %v37_v20 }
 0x106   :  { %v47_v22 = vsel %vm46_vm2, %v38_v21, 0.0 }
 0x107   :  { %48 = vadd.xlane.f32.xlu2 %v47_v22 }
 0x17a   :  { %v49_v23 = vpop.xlane.xlu2 %48 }
 0x17b   :  { %v50_v24 = vrot.slane %v49_v23, 4 }
 0x17d   :  { %v51_v25 = vadd.f32 %v50_v24, %v49_v23 }
 0x17f   :  { %v52_v26 = vrot.slane %v51_v25, 2 }
 0x181   :  { %v53_v27 = vadd.f32 %v52_v26, %v51_v25 }
 0x183   :  { %v54_v28 = vrot.slane %v53_v27, 1 }
 0x185   :  { %v55_v29 = vadd.f32 %v54_v28, %v53_v27 }
 0x187   :  { %75 = vpush %v55_v29 }
 0x1b8   :  { %s76_s16 = spop %75 }
 0x1b9   :  { %v57_v30 = vstv %s76_s16 }
 0x1ba   :  { %58 = vst [vmem:[#allocation2] sm:$0xff] %v57_v30 }
 0x1bb   :  { %69 = dma.vmem_to_hbm [thread:$0]  %s65_s1, 128, %s67_s15, [#allocation3]  }
 0x1bc   :  { %109 = dma.done.wait [#allocation3], 128  }
 0x1bd   :  { %110 = vsyncadd [#allocation3], 4294967168 }
 0x1be   :  { %74 = vsyncpa [#allocation3], 1 }

</bundles_post_ra>
